<compile_context>
chip_gen: v5e
topology: v5e:2x2
jax: 0.10.0
libtpu: 0.0.40
codegen_flags: <defaults>
</compile_context>

<pallas_src>
import math

import jax
import jax.numpy as jnp
from jax.experimental import pallas as pl
from jax.experimental.pallas import tpu as pltpu


_SINGLE_BLOCK_BYTES = 1 << 20   # below this total footprint: one full-array block
_MIN_GRID_STEPS = 4             # >=2 per TC on v7x megacore + load/store overlap


def _make_weighted_sum_kernel(n: int):
    """Element-wise kernel over one (tile_rows, cols) tile; n component inputs.

    w_ref holds weights with 1/total_weight already folded in; b_ref[0] holds
    bias/total_weight, so the epilogue is a single add (no per-element divide).
    """

    def kernel(w_ref, b_ref, *refs):
        # w_ref : SMEM (n,)  f32 scaled weights of the active components
        # b_ref : SMEM (1,)  f32 scaled bias
        # refs  : n input VMEM tiles followed by 1 output VMEM tile
        out_ref = refs[n]
        acc = refs[0][...].astype(jnp.float32) * w_ref[0]
        for i in range(1, n):   # static unroll; n is small and trace-time known
            acc = acc + refs[i][...].astype(jnp.float32) * w_ref[i]
        out_ref[...] = (acc + b_ref[0]).astype(out_ref.dtype)

    return kernel


def _vmem_capacity_bytes() -> int:
    try:
        return int(pltpu.get_tpu_info().vmem_capacity_bytes)
    except Exception:
        return 64 << 20   # conservative fallback (v7x per-TensorCore VMEM)


def _plan_layout(total: int, in_itemsizes, out_itemsize):
    """Pick a lane-dense 2D view (rows, cols), a row tile and grid step count.

    Returns (rows, cols, tile_rows, grid_steps, per_step_bytes).
    """
    cols = None
    for c in (1024, 512, 256, 128):
        if total % c == 0:
            cols = c
            break
    if cols is None:
        # Ragged size: no lane-dense view without a pad copy -> one full block.
        # TODO(synk): very large arrays whose element count is not a multiple
        # of 128 use a single (1, total) block instead of a tiled pipeline.
        return 1, total, 1, 1, (sum(in_itemsizes) + out_itemsize) * total

    rows = total // cols
    per_row_bytes = cols * (sum(in_itemsizes) + out_itemsize)
    total_bytes = rows * per_row_bytes

    # Rows per packed vreg for the narrowest dtype: f32 -> 8, bf16 -> 16, i8 -> 32.
    row_align = max(8, 32 // min(min(in_itemsizes), out_itemsize))

    if total_bytes <= _SINGLE_BLOCK_BYTES or rows < row_align:
        return rows, cols, rows, 1, total_bytes   # single full-array block

    vmem_cap = _vmem_capacity_bytes()
    # Per-step footprint budget: double-buffering keeps 2x this live in VMEM.
    tile_budget = min(12 << 20, vmem_cap // 5)
    tile_rows = min(max(1, tile_budget // per_row_bytes),
                    -(-rows // _MIN_GRID_STEPS))      # force >= _MIN_GRID_STEPS steps
    tile_rows = max(row_align, (tile_rows // row_align) * row_align)
    tile_rows = min(tile_rows, rows)
    grid_steps = -(-rows // tile_rows)                # ragged last block is masked
    return rows, cols, tile_rows, grid_steps, tile_rows * per_row_bytes


def weighted_sum_pallas(ys, weights, bias, total_weight):
    """Compute (sum_i weights[i] * ys[i] + bias) / total_weight in one kernel."""
    n = len(ys)
    out_shape = ys[0].shape
    # Match PyTorch: python-scalar weights do not promote the tensor dtype.
    out_dtype = jnp.result_type(*[y.dtype for y in ys])
    if not jnp.issubdtype(out_dtype, jnp.floating):
        out_dtype = jnp.float32

    # Fold 1/total_weight into weights and bias (removes per-element divide).
    # total_weight == 0 is PyTorch's degenerate divide-by-zero: keep that
    # division on the host so the element-wise inf/nan behaviour matches.
    if total_weight != 0:
        inv = 1.0 / float(total_weight)
        w_host = [float(w) * inv for w in weights]
        b_host = float(bias) * inv
        post_divide = None
    else:
        w_host = [float(w) for w in weights]
        b_host = float(bias)
        post_divide = float(total_weight)

    total = math.prod(out_shape)
    in_itemsizes = [jnp.dtype(y.dtype).itemsize for y in ys]
    out_itemsize = jnp.dtype(out_dtype).itemsize
    rows, cols, tile_rows, grid_steps, step_bytes = _plan_layout(
        total, in_itemsizes, out_itemsize)

    # Metadata-only reshape to the lane-dense view (no pad, no HBM copy).
    ys2d = [y.reshape(rows, cols) for y in ys]

    w = jnp.asarray(w_host, dtype=jnp.float32)
    b = jnp.asarray([b_host], dtype=jnp.float32)

    vmem_cap = _vmem_capacity_bytes()
    # Double-buffered per-step footprint + headroom; raise v5e's 16 MiB default.
    vmem_limit = max(16 << 20, min(int(vmem_cap * 0.9), 2 * step_bytes + (8 << 20)))

    tile_map = lambda i: (i, 0)
    out2d = pl.pallas_call(
        _make_weighted_sum_kernel(n),
        out_shape=jax.ShapeDtypeStruct((rows, cols), out_dtype),
        grid=(grid_steps,),
        in_specs=(
            [pl.BlockSpec(memory_space=pltpu.MemorySpace.SMEM),   # scaled weights
             pl.BlockSpec(memory_space=pltpu.MemorySpace.SMEM)]   # scaled bias
            + [pl.BlockSpec((tile_rows, cols), tile_map) for _ in range(n)]
        ),
        out_specs=pl.BlockSpec((tile_rows, cols), tile_map),
        compiler_params=pltpu.CompilerParams(
            # Row tiles are independent -> megacore-shard them on v7x.
            dimension_semantics=("parallel",) if grid_steps > 1 else ("arbitrary",),
            vmem_limit_bytes=vmem_limit,
        ),
    )(w, b, *ys2d)

    out = out2d.reshape(out_shape)
    if post_divide is not None:
        out = out / post_divide
    return out


class WeightedSumPallas:
    """JAX/Pallas analogue of the PyTorch `WeightedSum` module.

    Components are JAX callables producing same-shaped outputs.
    """
    # TODO(synk): arbitrary nn.Module submodules have no generic Pallas
    # translation; they execute as plain JAX and only the weighted-sum
    # combination stage runs as a Pallas kernel.

    def __init__(self, **components):
        self.submodules = dict(components)
        self.weights = {name: 1.0 for name in components}
        self.total_weight = float(len(components))

    def set_weight(self, name: str, value: float) -> None:
        assert name in self.submodules, "Unknown name!"
        self.weights[name] = float(value)
        self.total_weight = float(sum(self.weights.values()))

    def __call__(self, x):
        bias = float(sum(abs(w) for w in self.weights.values() if w < 0))
        active = [(n, m) for n, m in self.submodules.items() if self.weights[n] != 0]
        if not active:
            # Matches PyTorch: sum() over an empty generator is the scalar 0.
            return jnp.asarray((0.0 + bias) / self.total_weight, dtype=jnp.float32)
        ys = [m(x) for _, m in active]
        w = [self.weights[name] for name, _ in active]
        return weighted_sum_pallas(ys, w, bias, self.total_weight)


if __name__ == "__main__":
    key = jax.random.PRNGKey(0)
    x = jax.random.normal(key, (2, 4, 16, 16), dtype=jnp.float32)

    # Simple component "modules" with same-shaped outputs in [0, 1].
    components = {
        "sig":   lambda t: jax.nn.sigmoid(t),
        "gauss": lambda t: jnp.exp(-t * t),
        "sq":    lambda t: jnp.clip(t * t, 0.0, 1.0),
    }

    module = WeightedSumPallas(**components)
    module.set_weight("gauss", -0.5)   # exercises the negative-weight bias path
    module.set_weight("sq", 2.0)

    out = jax.block_until_ready(module(x))

    # Pure-JAX reference mirroring the PyTorch forward exactly.
    ref = sum(components[name](x) * module.weights[name]
              for name in components if module.weights[name] != 0)
    bias = sum(abs(w) for w in module.weights.values() if w < 0)
    ref = (ref + bias) / module.total_weight

    assert out.shape == x.shape
    assert out.dtype == jnp.float32
    assert jnp.allclose(out, ref, atol=1e-5, rtol=1e-5)
    print("KERNEL_OK")
</pallas_src>

<mosaic_0001>
module attributes {stable_mosaic.version = 11 : i64} {
  func.func @kernel(%arg0: i32, %arg1: memref<3xf32, #tpu.memory_space<smem>>, %arg2: memref<1xf32, #tpu.memory_space<smem>>, %arg3: memref<2x1024xf32, #tpu.memory_space<vmem>>, %arg4: memref<2x1024xf32, #tpu.memory_space<vmem>>, %arg5: memref<2x1024xf32, #tpu.memory_space<vmem>>, %arg6: memref<2x1024xf32, #tpu.memory_space<vmem>>) attributes {dimension_semantics = [#tpu.dimension_semantics<arbitrary>], iteration_bounds = array<i64: 1>, scalar_prefetch = 0 : i64, scratch_operands = 0 : i64, tpu.core_type = #tpu.core_type<tc>, window_params = [{transform_indices = @transform_0, window_bounds = array<i64: 3>}, {transform_indices = @transform_1, window_bounds = array<i64: 1>}, {transform_indices = @transform_2, window_bounds = array<i64: 2, 1024>}, {transform_indices = @transform_3, window_bounds = array<i64: 2, 1024>}, {transform_indices = @transform_4, window_bounds = array<i64: 2, 1024>}, {transform_indices = @transform_5, window_bounds = array<i64: 2, 1024>}]} {
    %c0 = arith.constant 0 : index
    %c0_0 = arith.constant 0 : index
    %0 = vector.load %arg3[%c0, %c0_0] : memref<2x1024xf32, #tpu.memory_space<vmem>>, vector<2x1024xf32>
    %c0_1 = arith.constant 0 : index
    %1 = memref.load %arg1[%c0_1] : memref<3xf32, #tpu.memory_space<smem>>
    %2 = vector.broadcast %1 : f32 to vector<2x1024xf32>
    %3 = arith.mulf %0, %2 : vector<2x1024xf32>
    %c0_2 = arith.constant 0 : index
    %c0_3 = arith.constant 0 : index
    %4 = vector.load %arg4[%c0_2, %c0_3] : memref<2x1024xf32, #tpu.memory_space<vmem>>, vector<2x1024xf32>
    %c1 = arith.constant 1 : index
    %5 = memref.load %arg1[%c1] : memref<3xf32, #tpu.memory_space<smem>>
    %6 = vector.broadcast %5 : f32 to vector<2x1024xf32>
    %7 = arith.mulf %4, %6 : vector<2x1024xf32>
    %8 = arith.addf %3, %7 : vector<2x1024xf32>
    %c0_4 = arith.constant 0 : index
    %c0_5 = arith.constant 0 : index
    %9 = vector.load %arg5[%c0_4, %c0_5] : memref<2x1024xf32, #tpu.memory_space<vmem>>, vector<2x1024xf32>
    %c2 = arith.constant 2 : index
    %10 = memref.load %arg1[%c2] : memref<3xf32, #tpu.memory_space<smem>>
    %11 = vector.broadcast %10 : f32 to vector<2x1024xf32>
    %12 = arith.mulf %9, %11 : vector<2x1024xf32>
    %13 = arith.addf %8, %12 : vector<2x1024xf32>
    %c0_6 = arith.constant 0 : index
    %14 = memref.load %arg2[%c0_6] : memref<1xf32, #tpu.memory_space<smem>>
    %15 = vector.broadcast %14 : f32 to vector<2x1024xf32>
    %16 = arith.addf %13, %15 : vector<2x1024xf32>
    %c0_7 = arith.constant 0 : index
    %c0_8 = arith.constant 0 : index
    %17 = vector.load %arg6[%c0_7, %c0_8] : memref<2x1024xf32, #tpu.memory_space<vmem>>, vector<2x1024xf32>
    tpu.vector_store %arg6[%c0_7, %c0_8], %16 {strides = array<i32>} : memref<2x1024xf32, #tpu.memory_space<vmem>>, vector<2x1024xf32>,
    return
  }
  func.func @transform_0(%arg0: i32) -> i32 {
    %c0_i32 = arith.constant 0 : i32
    %c0_i32_0 = arith.constant 0 : i32
    return %c0_i32 : i32
  }
  func.func @transform_1(%arg0: i32) -> i32 {
    %c0_i32 = arith.constant 0 : i32
    %c0_i32_0 = arith.constant 0 : i32
    return %c0_i32 : i32
  }
  func.func @transform_2(%arg0: i32) -> (i32, i32) {
    %c0_i32 = arith.constant 0 : i32
    %c0_i32_0 = arith.constant 0 : i32
    return %arg0, %c0_i32 : i32, i32
  }
  func.func @transform_3(%arg0: i32) -> (i32, i32) {
    %c0_i32 = arith.constant 0 : i32
    %c0_i32_0 = arith.constant 0 : i32
    return %arg0, %c0_i32 : i32, i32
  }
  func.func @transform_4(%arg0: i32) -> (i32, i32) {
    %c0_i32 = arith.constant 0 : i32
    %c0_i32_0 = arith.constant 0 : i32
    return %arg0, %c0_i32 : i32, i32
  }
  func.func @transform_5(%arg0: i32) -> (i32, i32) {
    %c0_i32 = arith.constant 0 : i32
    %c0_i32_0 = arith.constant 0 : i32
    return %arg0, %c0_i32 : i32, i32
  }
}

</mosaic_0001>

<bundles_post_ra>
// kernel: tpu_custom_call.1
= control target key start
LH: loop header
LB: loop body
LE: loop exit
PB: predicated region body
PF: predicated region fallthrough
CT: control target
= control target key end

     0   :  { %11 = vsyncpa [#allocation6], 0  ;;  %s299_s0 = inlined_call_operand.vmem [shape: f32[3], index: 0, kind: input, shape index: {}]   ;;  %s300_s1 = inlined_call_operand.<no memory space> [shape: f32[1], index: 1, kind: input, shape index: {}]   ;;  %s301_s2 = inlined_call_operand.hbm [shape: f32[2,1024], index: 2, kind: input, shape index: {}]   ;;  %s302_s3 = inlined_call_operand.hbm [shape: f32[2,1024], index: 3, kind: input, shape index: {}]   ;;  %s303_s4 = inlined_call_operand.hbm [shape: f32[2,1024], index: 4, kind: input, shape index: {}]   ;;  %s304_s5 = inlined_call_operand.hbm [shape: f32[2,1024], index: 5, kind: output, shape index: {}]  }
   0x1   :  { %12 = vsyncpa [#allocation4], 0 }
   0x2   :  { %13 = vsyncpa [#allocation9], 0  ;;  %s42_s20 = sshll.u32 %s302_s3, 4  ;;  %s43_s20 = int_to_ptr.hbm [resolvable:$true] %s42_s20 }
   0x3   :  { %14 = vsyncpa [#allocation5], 0  ;;  %s246_s21 = smov [#allocation8]   ;;  %s20_s25 = sshll.u32 %s299_s0, 4  ;;  %s21_s25 = int_to_ptr.vmem [resolvable:$true] %s20_s25 }
   0x4   :  { %s44_s22 = sshll.u32 %s246_s21, 4  ;;  %s247_s26 = smov [#allocation3]   ;;  %s45_s22 = int_to_ptr.vmem [resolvable:$true] %s44_s22 }
   0x5   :  { %47 = dma.hbm_to_vmem [thread:$0]  %s43_s20, 256, %s45_s22, [#allocation9]  }
   0x6   :  { %23 = dma.vmem_to_smem %s21_s25, 16, %s247_s26, [#allocation6]  }
   0x7   :  { %s31_s29 = sshll.u32 %s301_s2, 4  ;;  %s248_s30 = smov [#allocation7]   ;;  %s32_s29 = int_to_ptr.hbm [resolvable:$true] %s31_s29 }
   0x8   :  { %s33_s3 = sshll.u32 %s248_s30, 4  ;;  %s53_s8 = sshll.u32 %s303_s4, 4  ;;  %s34_s3 = int_to_ptr.vmem [resolvable:$true] %s33_s3  ;;  %s54_s8 = int_to_ptr.hbm [resolvable:$true] %s53_s8 }
   0x9   :  { %36 = dma.hbm_to_vmem [thread:$0]  %s32_s29, 256, %s34_s3, [#allocation4]  }
   0xa   :  { %s249_s9 = smov [#allocation10]  }
   0xb   :  { %s55_s0 = sshll.u32 %s249_s9, 4  ;;  %s56_s0 = int_to_ptr.vmem [resolvable:$true] %s55_s0 }
   0xc   :  { %58 = dma.hbm_to_vmem [thread:$0]  %s54_s8, 256, %s56_s0, [#allocation9]  }
   0xd   :  { %238 = dma.done.wait [#allocation6], 16  }
   0xe   :  { %239 = vsyncadd [#allocation6], 4294967280 }
   0xf   :  { %240 = dma.done.wait [#allocation4], 256  }
  0x10   :  { %241 = vsyncadd [#allocation4], 4294967040 }
  0x11   :  { %242 = dma.done.wait [#allocation9], 512  }
  0x12   :  { %243 = vsyncadd [#allocation9], 4294966784 }
  0x13   :  { %75 = sfence }
  0x14   :  { %s78_s2 = sld [smem:[#allocation3]]  ;;  %v76_v0 = vld [vmem:[#allocation7] sm:$0xff]  ;;  %v77_v1 = vld [vmem:[#allocation7 + $0x8] sm:$0xff]  ;;  %v82_v2 = vld [vmem:[#allocation8] sm:$0xff]  ;;  %v99_v17 = vstv %s300_s1  ;;  %s250_s13 = smov [#allocation11]  }
  0x15   :  { %s123_s10 = sld [smem:[#allocation3 + $0x1]]  ;;  %v83_v3 = vld [vmem:[#allocation8 + $0x8] sm:$0xff]  ;;  %v90_v5 = vld [vmem:[#allocation10] sm:$0xff]  ;;  %v91_v6 = vld [vmem:[#allocation10 + $0x8] sm:$0xff]  ;;  %s109_s14 = sshll.u32 %s250_s13, 4  ;;  %s110_s14 = int_to_ptr.vmem [resolvable:$true] %s109_s14 }
  0x16   :  { %s124_s11 = sld [smem:[#allocation3 + $0x2]]  ;;  %s111_s17 = sshll.u32 %s304_s5, 4  ;;  %s112_s17 = int_to_ptr.hbm [resolvable:$true] %s111_s17 }
  0x1a   :  { %v79_v4 = vstv %s78_s2 }
  0x1b   :  { %v80_v7 = vmul.f32 %v79_v4, %v76_v0  ;;  %v85_v8 = vstv %s123_s10  ;;  %v81_v9 = vmul.f32 %v79_v4, %v77_v1 }
  0x1c   :  { %v86_v10 = vmul.f32 %v85_v8, %v82_v2  ;;  %v93_v11 = vstv %s124_s11  ;;  %v87_v12 = vmul.f32 %v85_v8, %v83_v3 }
  0x1d   :  { %v94_v13 = vmul.f32 %v93_v11, %v90_v5  ;;  %v95_v14 = vmul.f32 %v93_v11, %v91_v6 }
  0x1e   :  { %v88_v15 = vadd.f32 %v86_v10, %v80_v7  ;;  %v89_v16 = vadd.f32 %v87_v12, %v81_v9 }
  0x20   :  { %v96_v18 = vadd.f32 %v94_v13, %v88_v15  ;;  %v97_v19 = vadd.f32 %v95_v14, %v89_v16 }
  0x22   :  { %v100_v20 = vadd.f32 %v99_v17, %v96_v18  ;;  %v101_v21 = vadd.f32 %v99_v17, %v97_v19 }
  0x24   :  { %102 = vst [vmem:[#allocation11] sm:$0xff] %v100_v20 }
  0x25   :  { %103 = vst [vmem:[#allocation11 + $0x8] sm:$0xff] %v101_v21 }
  0x26   :  { %114 = dma.vmem_to_hbm [thread:$0]  %s110_s14, 256, %s112_s17, [#allocation5]  }
  0x27   :  { %244 = dma.done.wait [#allocation5], 256  }
  0x28   :  { %245 = vsyncadd [#allocation5], 4294967040 }
  0x29   :  { %119 = vsyncpa [#allocation4], 1 }
  0x2a   :  { %120 = vsyncpa [#allocation9], 1 }
  0x2b   :  { %121 = vsyncpa [#allocation5], 1 }
  0x2c   :  { %122 = vsyncpa [#allocation6], 1 }

</bundles_post_ra>
